<compile_context>
chip_gen: v6e
topology: v6e:2x2x1
jax: 0.10.0
libtpu: 0.0.40
codegen_flags: <defaults>
</compile_context>

<pallas_src>
import functools

import jax
import jax.numpy as jnp
from jax.experimental import pallas as pl
from jax.experimental.pallas import tpu as pltpu


def _multi_step_kernel(
    T,              # static number of steps (closed over via functools.partial)
    state_ref,      # (B, S)      initial state                      [VMEM]
    actions_ref,    # (B, T*A)    actions, trailing dims collapsed    [VMEM]
    targets_ref,    # (B, T*S)    targets, trailing dims collapsed    [VMEM]
    w1s_ref,        # (S, H)      W1 rows acting on the state part of [s, a]
    w1a_ref,        # (A, H)      W1 rows acting on the action part of [s, a]
    b1_ref,         # (1, H)
    w2_ref,         # (H, H)
    b2_ref,         # (1, H)
    w3_ref,         # (H, S)
    b3_ref,         # (1, S)
    loss_ref,       # (1, 1)      output: accumulated multi-step loss [SMEM]
):
    B, S = state_ref.shape
    A = actions_ref.shape[1] // T

    # ---- Hoisted loads (broadcasts are not CSE'd inside loops) ------------
    w1s = w1s_ref[...]
    w1a = w1a_ref[...]
    b1 = b1_ref[...]
    w2 = w2_ref[...]
    b2 = b2_ref[...]
    w3 = w3_ref[...]
    b3 = b3_ref[...]

    # Chain-shortening fold (independent of the recurrence, issues early):
    #   h1_{t+1} = ReLU(pred_t @ W1s + a_{t+1} @ W1a + b1)
    #            = ReLU(h2_t @ (W3 @ W1s) + (b3 @ W1s + b1) + a_{t+1} @ W1a)
    w31 = jnp.dot(w3, w1s, preferred_element_type=jnp.float32)          # (H, H)
    b31 = jnp.dot(b3, w1s, preferred_element_type=jnp.float32) + b1     # (1, H)

    acts = actions_ref[...]      # (B, T*A) — a couple of vregs
    tgts = targets_ref[...]      # (B, T*S)

    # Per-step action contributions: independent of the carried state, so they
    # are pure MXU filler that overlaps the serial chain.  Static lane slices.
    ha = [
        jnp.dot(acts[:, t * A:(t + 1) * A], w1a,
                preferred_element_type=jnp.float32)                     # (B, H)
        for t in range(T)
    ]

    # ---- Serial recurrence: 2 dependent MXU ops per step, carry h2 --------
    h1 = jnp.maximum(
        jnp.dot(state_ref[...], w1s, preferred_element_type=jnp.float32)
        + ha[0] + b1,
        0.0,
    )
    h2 = jnp.maximum(jnp.dot(h1, w2, preferred_element_type=jnp.float32) + b2, 0.0)
    h2_all = [h2]
    for t in range(1, T):                                   # static; unrolled
        h1 = jnp.maximum(
            jnp.dot(h2, w31, preferred_element_type=jnp.float32) + b31 + ha[t],
            0.0,
        )
        h2 = jnp.maximum(
            jnp.dot(h1, w2, preferred_element_type=jnp.float32) + b2, 0.0
        )
        h2_all.append(h2)

    # ---- All T layer-3 matmuls as ONE batched pass, off the critical path --
    preds = (
        jnp.dot(jnp.concatenate(h2_all, axis=0), w3,
                preferred_element_type=jnp.float32)
        + b3
    )                                                        # (T*B, S), t-major

    # ---- Deferred discounted MSE: (B,S) accumulator, single reduce at end --
    acc = jnp.zeros((B, S), jnp.float32)
    for t in range(T):
        d = preds[t * B:(t + 1) * B, :] - tgts[:, t * S:(t + 1) * S]
        # discount = 0.99 * 0.99**t — compile-time immediate.
        acc = acc + jnp.float32(0.99 ** (t + 1)) * (d * d)

    # One cross-lane/sublane reduction; scalar goes out through SMEM.
    loss_ref[0, 0] = jnp.sum(acc) * jnp.float32(1.0 / (B * S))


@jax.jit
def multi_step_loss(params, state, actions, target_states):
    """params = (w1s, w1a, b1, w2, b2, w3, b3); state (B,S); actions (B,T,A);
    target_states (B,T,S).  Returns scalar float32 multi-step loss."""
    w1s, w1a, b1, w2, b2, w3, b3 = params
    B, S = state.shape
    _, T, A = actions.shape

    # Trailing-dim collapse only (row-major bitcast): no transpose / copy /
    # cast HLOs outside the pallas_call.  Time handling happens in-kernel via
    # static lane slices.
    actions_2d = actions.reshape(B, T * A)
    targets_2d = target_states.reshape(B, T * S)

    vmem_spec = lambda: pl.BlockSpec(memory_space=pltpu.MemorySpace.VMEM)

    out = pl.pallas_call(
        functools.partial(_multi_step_kernel, T),
        out_shape=jax.ShapeDtypeStruct((1, 1), jnp.float32),
        in_specs=[vmem_spec() for _ in range(10)],
        out_specs=pl.BlockSpec(memory_space=pltpu.MemorySpace.SMEM),
    )(state, actions_2d, targets_2d, w1s, w1a, b1, w2, b2, w3, b3)
    return out[0, 0]


def reference_multi_step_loss(params, state, actions, target_states):
    """Pure-JAX replica of MultiStepLoss.forward with the same MLP model + MSE."""
    w1s, w1a, b1, w2, b2, w3, b3 = params
    loss = jnp.float32(0.0)
    cur = state.astype(jnp.float32)
    d = 0.99
    for t in range(actions.shape[1]):
        h1 = jnp.maximum(cur @ w1s + actions[:, t, :] @ w1a + b1, 0.0)
        h2 = jnp.maximum(h1 @ w2 + b2, 0.0)
        pred = h2 @ w3 + b3
        loss = loss + jnp.float32(d) * jnp.mean((pred - target_states[:, t, :]) ** 2)
        d *= 0.99
        cur = pred
    return loss


if __name__ == "__main__":
    # Small deterministic shapes: batch=8, state_dim=4, action_dim=3, steps=6, hidden=32
    B, S, A, T, H = 8, 4, 3, 6, 32
    key = jax.random.PRNGKey(0)
    ks = jax.random.split(key, 10)

    # Deterministic synthetic model parameters (no checkpoint load).
    w1s = 0.1 * jax.random.normal(ks[0], (S, H), jnp.float32)
    w1a = 0.1 * jax.random.normal(ks[1], (A, H), jnp.float32)
    b1 = 0.1 * jax.random.normal(ks[2], (1, H), jnp.float32)
    w2 = 0.1 * jax.random.normal(ks[3], (H, H), jnp.float32)
    b2 = 0.1 * jax.random.normal(ks[4], (1, H), jnp.float32)
    w3 = 0.1 * jax.random.normal(ks[5], (H, S), jnp.float32)
    b3 = 0.1 * jax.random.normal(ks[6], (1, S), jnp.float32)
    params = (w1s, w1a, b1, w2, b2, w3, b3)

    state = jax.random.normal(ks[7], (B, S), jnp.float32)
    actions = jax.random.normal(ks[8], (B, T, A), jnp.float32)
    target_states = jax.random.normal(ks[9], (B, T, S), jnp.float32)

    loss = jax.block_until_ready(multi_step_loss(params, state, actions, target_states))
    ref = jax.block_until_ready(
        reference_multi_step_loss(params, state, actions, target_states)
    )

    # Note: folding W3 @ W1s reassociates f32 ops; differences stay far below
    # this tolerance at these magnitudes.
    assert jnp.allclose(loss, ref, rtol=1e-5, atol=1e-5), (loss, ref)
    print("KERNEL_OK")
</pallas_src>

<mosaic_0001>
module attributes {stable_mosaic.version = 11 : i64} {
  func.func @_multi_step_kernel(%arg0: memref<8x4xf32, #tpu.memory_space<vmem>>, %arg1: memref<8x18xf32, #tpu.memory_space<vmem>>, %arg2: memref<8x24xf32, #tpu.memory_space<vmem>>, %arg3: memref<4x32xf32, #tpu.memory_space<vmem>>, %arg4: memref<3x32xf32, #tpu.memory_space<vmem>>, %arg5: memref<1x32xf32, #tpu.memory_space<vmem>>, %arg6: memref<32x32xf32, #tpu.memory_space<vmem>>, %arg7: memref<1x32xf32, #tpu.memory_space<vmem>>, %arg8: memref<32x4xf32, #tpu.memory_space<vmem>>, %arg9: memref<1x4xf32, #tpu.memory_space<vmem>>, %arg10: memref<1x1xf32, #tpu.memory_space<smem>>) attributes {dimension_semantics = [], scalar_prefetch = 0 : i64, scratch_operands = 0 : i64, tpu.core_type = #tpu.core_type<tc>} {
    %c0 = arith.constant 0 : index
    %c0_0 = arith.constant 0 : index
    %0 = vector.load %arg3[%c0, %c0_0] : memref<4x32xf32, #tpu.memory_space<vmem>>, vector<4x32xf32>
    %c0_1 = arith.constant 0 : index
    %c0_2 = arith.constant 0 : index
    %1 = vector.load %arg4[%c0_1, %c0_2] : memref<3x32xf32, #tpu.memory_space<vmem>>, vector<3x32xf32>
    %c0_3 = arith.constant 0 : index
    %c0_4 = arith.constant 0 : index
    %2 = vector.load %arg5[%c0_3, %c0_4] : memref<1x32xf32, #tpu.memory_space<vmem>>, vector<1x32xf32>
    %c0_5 = arith.constant 0 : index
    %c0_6 = arith.constant 0 : index
    %3 = vector.load %arg6[%c0_5, %c0_6] : memref<32x32xf32, #tpu.memory_space<vmem>>, vector<32x32xf32>
    %c0_7 = arith.constant 0 : index
    %c0_8 = arith.constant 0 : index
    %4 = vector.load %arg7[%c0_7, %c0_8] : memref<1x32xf32, #tpu.memory_space<vmem>>, vector<1x32xf32>
    %c0_9 = arith.constant 0 : index
    %c0_10 = arith.constant 0 : index
    %5 = vector.load %arg8[%c0_9, %c0_10] : memref<32x4xf32, #tpu.memory_space<vmem>>, vector<32x4xf32>
    %c0_11 = arith.constant 0 : index
    %c0_12 = arith.constant 0 : index
    %6 = vector.load %arg9[%c0_11, %c0_12] : memref<1x4xf32, #tpu.memory_space<vmem>>, vector<1x4xf32>
    %cst = arith.constant dense<0.000000e+00> : vector<32x32xf32>
    %7 = tpu.matmul %5, %0, %cst {dimension_numbers = #tpu.dot_dimension_numbers<[1], [0], [0], [1], [0, 0, 1, 1], [], []>} : vector<32x4xf32>, vector<4x32xf32>, vector<32x32xf32> -> vector<32x32xf32>
    %cst_13 = arith.constant dense<0.000000e+00> : vector<1x32xf32>
    %8 = tpu.matmul %6, %0, %cst_13 {dimension_numbers = #tpu.dot_dimension_numbers<[1], [0], [0], [1], [0, 0, 1, 1], [], []>} : vector<1x4xf32>, vector<4x32xf32>, vector<1x32xf32> -> vector<1x32xf32>
    %9 = arith.addf %8, %2 : vector<1x32xf32>
    %c0_14 = arith.constant 0 : index
    %c0_15 = arith.constant 0 : index
    %10 = vector.load %arg1[%c0_14, %c0_15] : memref<8x18xf32, #tpu.memory_space<vmem>>, vector<8x18xf32>
    %c0_16 = arith.constant 0 : index
    %c0_17 = arith.constant 0 : index
    %11 = vector.load %arg2[%c0_16, %c0_17] : memref<8x24xf32, #tpu.memory_space<vmem>>, vector<8x24xf32>
    %12 = vector.extract_strided_slice %10 {offsets = [0, 0], sizes = [8, 3], strides = [1, 1]} : vector<8x18xf32> to vector<8x3xf32>
    %cst_18 = arith.constant dense<0.000000e+00> : vector<8x32xf32>
    %13 = tpu.matmul %12, %1, %cst_18 {dimension_numbers = #tpu.dot_dimension_numbers<[1], [0], [0], [1], [0, 0, 1, 1], [], []>} : vector<8x3xf32>, vector<3x32xf32>, vector<8x32xf32> -> vector<8x32xf32>
    %14 = vector.extract_strided_slice %10 {offsets = [0, 3], sizes = [8, 3], strides = [1, 1]} : vector<8x18xf32> to vector<8x3xf32>
    %cst_19 = arith.constant dense<0.000000e+00> : vector<8x32xf32>
    %15 = tpu.matmul %14, %1, %cst_19 {dimension_numbers = #tpu.dot_dimension_numbers<[1], [0], [0], [1], [0, 0, 1, 1], [], []>} : vector<8x3xf32>, vector<3x32xf32>, vector<8x32xf32> -> vector<8x32xf32>
    %16 = vector.extract_strided_slice %10 {offsets = [0, 6], sizes = [8, 3], strides = [1, 1]} : vector<8x18xf32> to vector<8x3xf32>
    %cst_20 = arith.constant dense<0.000000e+00> : vector<8x32xf32>
    %17 = tpu.matmul %16, %1, %cst_20 {dimension_numbers = #tpu.dot_dimension_numbers<[1], [0], [0], [1], [0, 0, 1, 1], [], []>} : vector<8x3xf32>, vector<3x32xf32>, vector<8x32xf32> -> vector<8x32xf32>
    %18 = vector.extract_strided_slice %10 {offsets = [0, 9], sizes = [8, 3], strides = [1, 1]} : vector<8x18xf32> to vector<8x3xf32>
    %cst_21 = arith.constant dense<0.000000e+00> : vector<8x32xf32>
    %19 = tpu.matmul %18, %1, %cst_21 {dimension_numbers = #tpu.dot_dimension_numbers<[1], [0], [0], [1], [0, 0, 1, 1], [], []>} : vector<8x3xf32>, vector<3x32xf32>, vector<8x32xf32> -> vector<8x32xf32>
    %20 = vector.extract_strided_slice %10 {offsets = [0, 12], sizes = [8, 3], strides = [1, 1]} : vector<8x18xf32> to vector<8x3xf32>
    %cst_22 = arith.constant dense<0.000000e+00> : vector<8x32xf32>
    %21 = tpu.matmul %20, %1, %cst_22 {dimension_numbers = #tpu.dot_dimension_numbers<[1], [0], [0], [1], [0, 0, 1, 1], [], []>} : vector<8x3xf32>, vector<3x32xf32>, vector<8x32xf32> -> vector<8x32xf32>
    %22 = vector.extract_strided_slice %10 {offsets = [0, 15], sizes = [8, 3], strides = [1, 1]} : vector<8x18xf32> to vector<8x3xf32>
    %cst_23 = arith.constant dense<0.000000e+00> : vector<8x32xf32>
    %23 = tpu.matmul %22, %1, %cst_23 {dimension_numbers = #tpu.dot_dimension_numbers<[1], [0], [0], [1], [0, 0, 1, 1], [], []>} : vector<8x3xf32>, vector<3x32xf32>, vector<8x32xf32> -> vector<8x32xf32>
    %c0_24 = arith.constant 0 : index
    %c0_25 = arith.constant 0 : index
    %24 = vector.load %arg0[%c0_24, %c0_25] : memref<8x4xf32, #tpu.memory_space<vmem>>, vector<8x4xf32>
    %cst_26 = arith.constant dense<0.000000e+00> : vector<8x32xf32>
    %25 = tpu.matmul %24, %0, %cst_26 {dimension_numbers = #tpu.dot_dimension_numbers<[1], [0], [0], [1], [0, 0, 1, 1], [], []>} : vector<8x4xf32>, vector<4x32xf32>, vector<8x32xf32> -> vector<8x32xf32>
    %26 = arith.addf %25, %13 : vector<8x32xf32>
    %27 = vector.broadcast %2 : vector<1x32xf32> to vector<8x32xf32>
    %28 = arith.addf %26, %27 : vector<8x32xf32>
    %cst_27 = arith.constant 0.000000e+00 : f32
    %29 = vector.broadcast %cst_27 : f32 to vector<8x32xf32>
    %30 = arith.maximumf %28, %29 : vector<8x32xf32>
    %cst_28 = arith.constant dense<0.000000e+00> : vector<8x32xf32>
    %31 = tpu.matmul %30, %3, %cst_28 {dimension_numbers = #tpu.dot_dimension_numbers<[1], [0], [0], [1], [0, 0, 1, 1], [], []>} : vector<8x32xf32>, vector<32x32xf32>, vector<8x32xf32> -> vector<8x32xf32>
    %32 = vector.broadcast %4 : vector<1x32xf32> to vector<8x32xf32>
    %33 = arith.addf %31, %32 : vector<8x32xf32>
    %cst_29 = arith.constant 0.000000e+00 : f32
    %34 = vector.broadcast %cst_29 : f32 to vector<8x32xf32>
    %35 = arith.maximumf %33, %34 : vector<8x32xf32>
    %cst_30 = arith.constant dense<0.000000e+00> : vector<8x32xf32>
    %36 = tpu.matmul %35, %7, %cst_30 {dimension_numbers = #tpu.dot_dimension_numbers<[1], [0], [0], [1], [0, 0, 1, 1], [], []>} : vector<8x32xf32>, vector<32x32xf32>, vector<8x32xf32> -> vector<8x32xf32>
    %37 = vector.broadcast %9 : vector<1x32xf32> to vector<8x32xf32>
    %38 = arith.addf %36, %37 : vector<8x32xf32>
    %39 = arith.addf %38, %15 : vector<8x32xf32>
    %cst_31 = arith.constant 0.000000e+00 : f32
    %40 = vector.broadcast %cst_31 : f32 to vector<8x32xf32>
    %41 = arith.maximumf %39, %40 : vector<8x32xf32>
    %cst_32 = arith.constant dense<0.000000e+00> : vector<8x32xf32>
    %42 = tpu.matmul %41, %3, %cst_32 {dimension_numbers = #tpu.dot_dimension_numbers<[1], [0], [0], [1], [0, 0, 1, 1], [], []>} : vector<8x32xf32>, vector<32x32xf32>, vector<8x32xf32> -> vector<8x32xf32>
    %43 = vector.broadcast %4 : vector<1x32xf32> to vector<8x32xf32>
    %44 = arith.addf %42, %43 : vector<8x32xf32>
    %cst_33 = arith.constant 0.000000e+00 : f32
    %45 = vector.broadcast %cst_33 : f32 to vector<8x32xf32>
    %46 = arith.maximumf %44, %45 : vector<8x32xf32>
    %cst_34 = arith.constant dense<0.000000e+00> : vector<8x32xf32>
    %47 = tpu.matmul %46, %7, %cst_34 {dimension_numbers = #tpu.dot_dimension_numbers<[1], [0], [0], [1], [0, 0, 1, 1], [], []>} : vector<8x32xf32>, vector<32x32xf32>, vector<8x32xf32> -> vector<8x32xf32>
    %48 = vector.broadcast %9 : vector<1x32xf32> to vector<8x32xf32>
    %49 = arith.addf %47, %48 : vector<8x32xf32>
    %50 = arith.addf %49, %17 : vector<8x32xf32>
    %cst_35 = arith.constant 0.000000e+00 : f32
    %51 = vector.broadcast %cst_35 : f32 to vector<8x32xf32>
    %52 = arith.maximumf %50, %51 : vector<8x32xf32>
    %cst_36 = arith.constant dense<0.000000e+00> : vector<8x32xf32>
    %53 = tpu.matmul %52, %3, %cst_36 {dimension_numbers = #tpu.dot_dimension_numbers<[1], [0], [0], [1], [0, 0, 1, 1], [], []>} : vector<8x32xf32>, vector<32x32xf32>, vector<8x32xf32> -> vector<8x32xf32>
    %54 = vector.broadcast %4 : vector<1x32xf32> to vector<8x32xf32>
    %55 = arith.addf %53, %54 : vector<8x32xf32>
    %cst_37 = arith.constant 0.000000e+00 : f32
    %56 = vector.broadcast %cst_37 : f32 to vector<8x32xf32>
    %57 = arith.maximumf %55, %56 : vector<8x32xf32>
    %cst_38 = arith.constant dense<0.000000e+00> : vector<8x32xf32>
    %58 = tpu.matmul %57, %7, %cst_38 {dimension_numbers = #tpu.dot_dimension_numbers<[1], [0], [0], [1], [0, 0, 1, 1], [], []>} : vector<8x32xf32>, vector<32x32xf32>, vector<8x32xf32> -> vector<8x32xf32>
    %59 = vector.broadcast %9 : vector<1x32xf32> to vector<8x32xf32>
    %60 = arith.addf %58, %59 : vector<8x32xf32>
    %61 = arith.addf %60, %19 : vector<8x32xf32>
    %cst_39 = arith.constant 0.000000e+00 : f32
    %62 = vector.broadcast %cst_39 : f32 to vector<8x32xf32>
    %63 = arith.maximumf %61, %62 : vector<8x32xf32>
    %cst_40 = arith.constant dense<0.000000e+00> : vector<8x32xf32>
    %64 = tpu.matmul %63, %3, %cst_40 {dimension_numbers = #tpu.dot_dimension_numbers<[1], [0], [0], [1], [0, 0, 1, 1], [], []>} : vector<8x32xf32>, vector<32x32xf32>, vector<8x32xf32> -> vector<8x32xf32>
    %65 = vector.broadcast %4 : vector<1x32xf32> to vector<8x32xf32>
    %66 = arith.addf %64, %65 : vector<8x32xf32>
    %cst_41 = arith.constant 0.000000e+00 : f32
    %67 = vector.broadcast %cst_41 : f32 to vector<8x32xf32>
    %68 = arith.maximumf %66, %67 : vector<8x32xf32>
    %cst_42 = arith.constant dense<0.000000e+00> : vector<8x32xf32>
    %69 = tpu.matmul %68, %7, %cst_42 {dimension_numbers = #tpu.dot_dimension_numbers<[1], [0], [0], [1], [0, 0, 1, 1], [], []>} : vector<8x32xf32>, vector<32x32xf32>, vector<8x32xf32> -> vector<8x32xf32>
    %70 = vector.broadcast %9 : vector<1x32xf32> to vector<8x32xf32>
    %71 = arith.addf %69, %70 : vector<8x32xf32>
    %72 = arith.addf %71, %21 : vector<8x32xf32>
    %cst_43 = arith.constant 0.000000e+00 : f32
    %73 = vector.broadcast %cst_43 : f32 to vector<8x32xf32>
    %74 = arith.maximumf %72, %73 : vector<8x32xf32>
    %cst_44 = arith.constant dense<0.000000e+00> : vector<8x32xf32>
    %75 = tpu.matmul %74, %3, %cst_44 {dimension_numbers = #tpu.dot_dimension_numbers<[1], [0], [0], [1], [0, 0, 1, 1], [], []>} : vector<8x32xf32>, vector<32x32xf32>, vector<8x32xf32> -> vector<8x32xf32>
    %76 = vector.broadcast %4 : vector<1x32xf32> to vector<8x32xf32>
    %77 = arith.addf %75, %76 : vector<8x32xf32>
    %cst_45 = arith.constant 0.000000e+00 : f32
    %78 = vector.broadcast %cst_45 : f32 to vector<8x32xf32>
    %79 = arith.maximumf %77, %78 : vector<8x32xf32>
    %cst_46 = arith.constant dense<0.000000e+00> : vector<8x32xf32>
    %80 = tpu.matmul %79, %7, %cst_46 {dimension_numbers = #tpu.dot_dimension_numbers<[1], [0], [0], [1], [0, 0, 1, 1], [], []>} : vector<8x32xf32>, vector<32x32xf32>, vector<8x32xf32> -> vector<8x32xf32>
    %81 = vector.broadcast %9 : vector<1x32xf32> to vector<8x32xf32>
    %82 = arith.addf %80, %81 : vector<8x32xf32>
    %83 = arith.addf %82, %23 : vector<8x32xf32>
    %cst_47 = arith.constant 0.000000e+00 : f32
    %84 = vector.broadcast %cst_47 : f32 to vector<8x32xf32>
    %85 = arith.maximumf %83, %84 : vector<8x32xf32>
    %cst_48 = arith.constant dense<0.000000e+00> : vector<8x32xf32>
    %86 = tpu.matmul %85, %3, %cst_48 {dimension_numbers = #tpu.dot_dimension_numbers<[1], [0], [0], [1], [0, 0, 1, 1], [], []>} : vector<8x32xf32>, vector<32x32xf32>, vector<8x32xf32> -> vector<8x32xf32>
    %87 = vector.broadcast %4 : vector<1x32xf32> to vector<8x32xf32>
    %88 = arith.addf %86, %87 : vector<8x32xf32>
    %cst_49 = arith.constant 0.000000e+00 : f32
    %89 = vector.broadcast %cst_49 : f32 to vector<8x32xf32>
    %90 = arith.maximumf %88, %89 : vector<8x32xf32>
    %91 = tpu.concatenate %35, %46, %57, %68, %79, %90 in 0 : vector<8x32xf32>, vector<8x32xf32>, vector<8x32xf32>, vector<8x32xf32>, vector<8x32xf32>, vector<8x32xf32> -> vector<48x32xf32>
    %cst_50 = arith.constant dense<0.000000e+00> : vector<48x4xf32>
    %92 = tpu.matmul %91, %5, %cst_50 {dimension_numbers = #tpu.dot_dimension_numbers<[1], [0], [0], [1], [0, 0, 1, 1], [], []>} : vector<48x32xf32>, vector<32x4xf32>, vector<48x4xf32> -> vector<48x4xf32>
    %93 = vector.broadcast %6 : vector<1x4xf32> to vector<48x4xf32>
    %94 = arith.addf %92, %93 : vector<48x4xf32>
    %cst_51 = arith.constant 0.000000e+00 : f32
    %95 = vector.broadcast %cst_51 : f32 to vector<8x4xf32>
    %96 = vector.extract_strided_slice %94 {offsets = [0, 0], sizes = [8, 4], strides = [1, 1]} : vector<48x4xf32> to vector<8x4xf32>
    %97 = vector.extract_strided_slice %11 {offsets = [0, 0], sizes = [8, 4], strides = [1, 1]} : vector<8x24xf32> to vector<8x4xf32>
    %98 = arith.subf %96, %97 : vector<8x4xf32>
    %99 = arith.mulf %98, %98 : vector<8x4xf32>
    %cst_52 = arith.constant 9.900000e-01 : f32
    %100 = vector.broadcast %cst_52 : f32 to vector<8x4xf32>
    %101 = arith.mulf %100, %99 : vector<8x4xf32>
    %102 = arith.addf %95, %101 : vector<8x4xf32>
    %103 = vector.extract_strided_slice %94 {offsets = [8, 0], sizes = [8, 4], strides = [1, 1]} : vector<48x4xf32> to vector<8x4xf32>
    %104 = vector.extract_strided_slice %11 {offsets = [0, 4], sizes = [8, 4], strides = [1, 1]} : vector<8x24xf32> to vector<8x4xf32>
    %105 = arith.subf %103, %104 : vector<8x4xf32>
    %106 = arith.mulf %105, %105 : vector<8x4xf32>
    %cst_53 = arith.constant 0.980099976 : f32
    %107 = vector.broadcast %cst_53 : f32 to vector<8x4xf32>
    %108 = arith.mulf %107, %106 : vector<8x4xf32>
    %109 = arith.addf %102, %108 : vector<8x4xf32>
    %110 = vector.extract_strided_slice %94 {offsets = [16, 0], sizes = [8, 4], strides = [1, 1]} : vector<48x4xf32> to vector<8x4xf32>
    %111 = vector.extract_strided_slice %11 {offsets = [0, 8], sizes = [8, 4], strides = [1, 1]} : vector<8x24xf32> to vector<8x4xf32>
    %112 = arith.subf %110, %111 : vector<8x4xf32>
    %113 = arith.mulf %112, %112 : vector<8x4xf32>
    %cst_54 = arith.constant 9.702990e-01 : f32
    %114 = vector.broadcast %cst_54 : f32 to vector<8x4xf32>
    %115 = arith.mulf %114, %113 : vector<8x4xf32>
    %116 = arith.addf %109, %115 : vector<8x4xf32>
    %117 = vector.extract_strided_slice %94 {offsets = [24, 0], sizes = [8, 4], strides = [1, 1]} : vector<48x4xf32> to vector<8x4xf32>
    %118 = vector.extract_strided_slice %11 {offsets = [0, 12], sizes = [8, 4], strides = [1, 1]} : vector<8x24xf32> to vector<8x4xf32>
    %119 = arith.subf %117, %118 : vector<8x4xf32>
    %120 = arith.mulf %119, %119 : vector<8x4xf32>
    %cst_55 = arith.constant 9.605960e-01 : f32
    %121 = vector.broadcast %cst_55 : f32 to vector<8x4xf32>
    %122 = arith.mulf %121, %120 : vector<8x4xf32>
    %123 = arith.addf %116, %122 : vector<8x4xf32>
    %124 = vector.extract_strided_slice %94 {offsets = [32, 0], sizes = [8, 4], strides = [1, 1]} : vector<48x4xf32> to vector<8x4xf32>
    %125 = vector.extract_strided_slice %11 {offsets = [0, 16], sizes = [8, 4], strides = [1, 1]} : vector<8x24xf32> to vector<8x4xf32>
    %126 = arith.subf %124, %125 : vector<8x4xf32>
    %127 = arith.mulf %126, %126 : vector<8x4xf32>
    %cst_56 = arith.constant 9.509900e-01 : f32
    %128 = vector.broadcast %cst_56 : f32 to vector<8x4xf32>
    %129 = arith.mulf %128, %127 : vector<8x4xf32>
    %130 = arith.addf %123, %129 : vector<8x4xf32>
    %131 = vector.extract_strided_slice %94 {offsets = [40, 0], sizes = [8, 4], strides = [1, 1]} : vector<48x4xf32> to vector<8x4xf32>
    %132 = vector.extract_strided_slice %11 {offsets = [0, 20], sizes = [8, 4], strides = [1, 1]} : vector<8x24xf32> to vector<8x4xf32>
    %133 = arith.subf %131, %132 : vector<8x4xf32>
    %134 = arith.mulf %133, %133 : vector<8x4xf32>
    %cst_57 = arith.constant 0.941480159 : f32
    %135 = vector.broadcast %cst_57 : f32 to vector<8x4xf32>
    %136 = arith.mulf %135, %134 : vector<8x4xf32>
    %137 = arith.addf %130, %136 : vector<8x4xf32>
    %138 = vector.shape_cast %137 : vector<8x4xf32> to vector<1x8x4xf32>
    %cst_58 = arith.constant dense<0.000000e+00> : vector<1xf32>
    %139 = vector.multi_reduction <add>, %138, %cst_58 [1, 2] : vector<1x8x4xf32> to vector<1xf32>
    %140 = vector.shape_cast %139 : vector<1xf32> to vector<1x1x1xf32>
    %141 = vector.extract %140[0, 0, 0] : f32 from vector<1x1x1xf32>
    %cst_59 = arith.constant 3.125000e-02 : f32
    %142 = arith.mulf %141, %cst_59 : f32
    %c0_60 = arith.constant 0 : index
    %c0_61 = arith.constant 0 : index
    %143 = memref.load %arg10[%c0_60, %c0_61] : memref<1x1xf32, #tpu.memory_space<smem>>
    memref.store %142, %arg10[%c0_60, %c0_61] : memref<1x1xf32, #tpu.memory_space<smem>>
    return
  }
}

</mosaic_0001>

<bundles_post_ra>
// kernel: multi_step_loss.1
= control target key start
LH: loop header
LB: loop body
LE: loop exit
PB: predicated region body
PF: predicated region fallthrough
CT: control target
= control target key end

     0   :  { %s2090_s17 = smov 122   ;;  %v2091_v2 = vmov 0.0   ;;  %vm230_vm0 = vcmask 1042432   ;;  %vm226_vm1 = vcmask 23552   ;;  %vm2092_vm2 = vmmov 0   ;;  %s2485_s0 = inlined_call_operand.vmem [shape: f32[8,4], index: 0, kind: input, shape index: {}]   ;;  %s2486_s1 = inlined_call_operand.vmem [shape: f32[8,18], index: 1, kind: input, shape index: {}]   ;;  %s2487_s2 = inlined_call_operand.vmem [shape: f32[8,24], index: 2, kind: input, shape index: {}]   ;;  %s2488_s3 = inlined_call_operand.vmem [shape: f32[4,32], index: 3, kind: input, shape index: {}]   ;;  %s2489_s4 = inlined_call_operand.vmem [shape: f32[3,32], index: 4, kind: input, shape index: {}]   ;;  %s2490_s5 = inlined_call_operand.vmem [shape: f32[1,32], index: 5, kind: input, shape index: {}]   ;;  %s2491_s6 = inlined_call_operand.vmem [shape: f32[32,32], index: 6, kind: input, shape index: {}]   ;;  %s2492_s7 = inlined_call_operand.vmem [shape: f32[1,32], index: 7, kind: input, shape index: {}]   ;;  %s2493_s8 = inlined_call_operand.vmem [shape: f32[32,4], index: 8, kind: input, shape index: {}]   ;;  %s2494_s9 = inlined_call_operand.vmem [shape: f32[1,4], index: 9, kind: input, shape index: {}]   ;;  %s2495_s10 = inlined_call_operand.hbm [shape: f32[1,1], index: 10, kind: output, shape index: {}]  }
   0x1   :  { %v224_v0 = vld [vmem:[%s2486_s1] sm:$0xff]  ;;  %1893 = vmatprep.subr.mxu1 %v2091_v2  ;;  %1895 = vmatprep.mubr.msk.f32.mxu1 %vm2092_vm2, %v2091_v2 }
   0x2   :  { %v2163_v1 = vld [vmem:[%s2489_s4] sm:$0x7]  ;;  %378 = vrot.lane.b32.xlu0 %v224_v0, %s2090_s17 }
   0x3   :  { %1894 = vmatpush3.msk.msra.mxu1 %vm230_vm0, %v2163_v1  ;;  %v2179_v3 = vld [vmem:[%s2493_s8] sm:$0xff] }
   0x4   :  { %1896 = vmatmul.mubr.msk.f32.vlgmr.msra.gmra.mxu1 %vm226_vm1, %v224_v0  ;;  %1903 = vmatprep.subr.mxu1 %v2091_v2 }
   0x5   :  { %1904 = vmatpush3.msk.msra.mxu1 %vm230_vm0, %v2163_v1  ;;  %1905 = vmatprep.mubr.msk.f32.mxu1 %vm2092_vm2, %v2091_v2 }
   0x6   :  { %15 = vsyncpa [#allocation3], 0  ;;  %s2093_s18 = smov 116   ;;  %1913 = vmatprep.subr.mxu1 %v2091_v2  ;;  %v36_v4 = vld [vmem:[%s2488_s3] sm:$0xf]  ;;  %vm62_vm3 = vcmask 1043456   ;;  %v749_v22 = vlaneseq }
   0x7   :  { %526 = vrot.lane.b32.xlu0 %v224_v0, %s2093_s18  ;;  %v2189_v5 = vld [vmem:[%s2493_s8 + $0x8] sm:$0xff]  ;;  %vm49_vm4 = vcmask 31744   ;;  %s2094_s23 = smov 125   ;;  %1880 = vmatprep.subr.msk.mxu0 %vm62_vm3, %v36_v4  ;;  %v2195_v6 = vld [vmem:[%s2493_s8 + $0x10] sm:$0xff]  ;;  %s2095_s3 = smov 113   ;;  %v2208_v7 = vld [vmem:[%s2493_s8 + $0x18] sm:$0xff] }
   0x8   :  { %304 = vrot.lane.b32.xlu1 %v224_v0, %s2094_s23  ;;  %1881 = vmatpush3.msk.msra.mxu0 %vm62_vm3, %v36_v4  ;;  %s2096_s28 = smov 119   ;;  %v2219_v8 = vld [vmem:[%s2494_s9] sm:$0x1]  ;;  %v2263_v15 = vld [vmem:[%s2491_s6 + $0x18] sm:$0xff]  ;;  %v2270_v16 = vld [vmem:[%s2491_s6 + $0x10] sm:$0xff]  ;;  %v750_v25 = vshrl.u32 %v749_v22, 7 }
   0x9   :  { %1882 = vmatprep.mubr.msk.f32.mxu0 %vm49_vm4, %v2179_v3  ;;  %1888 = vmatprep.subr.mxu0 %v2091_v2  ;;  %v674_v12 = vld [vmem:[%s2485_s0] sm:$0xff]  ;;  %v2277_v17 = vld [vmem:[%s2491_s6 + $0x8] sm:$0xff]  ;;  %vm762_vm5 = vcmask 261120   ;;  %s2097_s20 = smov 124   ;;  %s2098_s21 = smov 120  }
   0xa   :  { %1883 = vmatmul.mubr.msk.f32.vlgmr.msra.gmra.mxu0 %vm49_vm4, %v2189_v5  ;;  %v2284_v18 = vld [vmem:[%s2491_s6] sm:$0xff]  ;;  %v2303_v29 = vsub.s32 0, %v750_v25  ;;  %s2101_s24 = smov [#allocation2]  }
   0xb   :  { %600 = vrot.lane.b32.xlu0 %v224_v0, %s2095_s3  ;;  %1885 = vmatprep.mubr.msk.f32.mxu0 %vm49_vm4, %v2195_v6  ;;  %v38_v27 = vld [vmem:[%s2490_s5] sm:$0x1] }
   0xc   :  { %452 = vrot.lane.b32.xlu1 %v224_v0, %s2096_s28  ;;  %1889 = vmatpush3.msk.msra.mxu0 %vm62_vm3, %v36_v4  ;;  %v752_v38 = vrot.slane %v38_v27, %v2303_v29  ;;  %v2335_v49 = vld [vmem:[%s2492_s7] ss:$0 sm:$0xff] }
   0xd   :  { %1898 = vmatprep.subr.mxu0 %v2091_v2 }
   0xe   :  { %1886 = vmatmul.mubr.msk.f32.gmra.mxu0 %vm49_vm4, %v2208_v7 }
   0xf   :  { %1890 = vmatprep.mubr.msk.f32.mxu0 %vm2092_vm2, %v2091_v2 }
  0x12   :  { %1891 = vmatmul.mubr.msk.f32.vlgmr.msra.gmra.mxu0 %vm49_vm4, %v2219_v8 }
  0x13   :  { %1899 = vmatpush3.msk.msra.mxu0 %vm230_vm0, %v2163_v1  ;;  %1900 = vmatprep.mubr.msk.f32.mxu0 %vm2092_vm2, %v2091_v2 }
  0x14   :  { %1908 = vmatprep.subr.mxu0 %v2091_v2 }
  0x74   :  { %v379_v9 = vpop.permute.xlu0 %378 }
  0x75   :  { %1906 = vmatmul.mubr.msk.f32.vlgmr.msra.gmra.mxu1 %vm226_vm1, %v379_v9 }
  0x76   :  { %1914 = vmatpush3.msk.msra.mxu1 %vm230_vm0, %v2163_v1  ;;  %1915 = vmatprep.mubr.msk.f32.mxu1 %vm2092_vm2, %v2091_v2 }
  0x77   :  { %1923 = vmatprep.subr.mxu1 %v2091_v2 }
  0x79   :  { %v527_v10 = vpop.permute.xlu0 %526 }
  0x7a   :  { %1916 = vmatmul.mubr.msk.f32.vlgmr.msra.gmra.mxu1 %vm226_vm1, %v527_v10  ;;  %v305_v11 = vpop.permute.xlu1 %304 }
  0x7b   :  { %1924 = vmatpush3.msk.msra.mxu1 %vm62_vm3, %v36_v4  ;;  %1925 = vmatprep.mubr.msk.f32.mxu1 %vm2092_vm2, %v2091_v2 }
  0x7c   :  { %1901 = vmatmul.mubr.msk.f32.vlgmr.msra.gmra.mxu0 %vm226_vm1, %v305_v11  ;;  %1939 = vmatprep.subr.mxu1 %v2091_v2 }
  0x7d   :  { %1909 = vmatpush3.msk.msra.mxu0 %vm230_vm0, %v2163_v1  ;;  %1910 = vmatprep.mubr.msk.f32.mxu0 %vm2092_vm2, %v2091_v2  ;;  %v601_v14 = vpop.permute.xlu0 %600 }
  0x7e   :  { %1926 = vmatmul.mubr.msk.f32.vlgmr.msra.gmra.mxu1 %vm49_vm4, %v674_v12  ;;  %1918 = vmatprep.subr.mxu0 %v2091_v2  ;;  %v453_v13 = vpop.permute.xlu1 %452 }
  0x7f   :  { %1947 = vmatprep.mubr.msk.f32.mxu1 %vm2092_vm2, %v2091_v2 }
  0x80   :  { %1911 = vmatmul.mubr.msk.f32.vlgmr.msra.gmra.mxu0 %vm226_vm1, %v453_v13 }
  0x81   :  { %1919 = vmatpush3.msk.msra.mxu0 %vm230_vm0, %v2163_v1  ;;  %1920 = vmatprep.mubr.msk.f32.mxu0 %vm2092_vm2, %v2091_v2 }
  0x82   :  { %1928 = vmatprep.subr.mxu0 %v2091_v2 }
  0x84   :  { %1921 = vmatmul.mubr.msk.f32.vlgmr.msra.gmra.mxu0 %vm226_vm1, %v601_v14 }
  0x85   :  { %1936 = vmatprep.mubr.msk.f32.mxu0 %vm2092_vm2, %v2091_v2  ;;  %1929 = vmatpush3.msra.mxu0 %v2263_v15 }
  0x86   :  { %1930 = vmatprep.subr.mxu0 %v2091_v2 }
  0x87   :  { %1931 = vmatpush3.msra.mxu0 %v2270_v16 }
  0x88   :  { %1932 = vmatprep.subr.mxu0 %v2091_v2 }
  0x89   :  { %1933 = vmatpush3.msra.mxu0 %v2277_v17 }
  0x8a   :  { %1934 = vmatprep.subr.mxu0 %v2091_v2 }
  0x8b   :  { %1935 = vmatpush3.msra.mxu0 %v2284_v18 }
  0x8c   :  { %1950 = vmatprep.subr.mxu0 %v2091_v2 }
  0xc4   :  { %v300_v19 = vpop.f32.mrf.mxu1 }
  0xc6   :  { %v1897_v20 = vpop.f32.mrf.mxu1 }
  0xca   :  { %v2288_v21 = vpop.f32.mrf.mxu0 }
  0xcc   :  { %v2290_v23 = vpop.f32.mrf.mxu0 }
  0xce   :  { %v2292_v24 = vpop.f32.mrf.mxu0 }
  0xcf   :  { %1940 = vmatpush3.msra.mxu1 %v2292_v24 }
  0xd0   :  { %v2295_v26 = vpop.f32.mrf.mxu0  ;;  %1941 = vmatprep.subr.mxu1 %v2091_v2 }
  0xd1   :  { %1942 = vmatpush3.msra.mxu1 %v2295_v26 }
  0xd2   :  { %1943 = vmatprep.subr.mxu1 %v2091_v2  ;;  %v220_v28 = vpop.f32.mrf.mxu0 }
  0xd3   :  { %1944 = vmatpush3.msra.mxu1 %v2288_v21  ;;  %v221_v30 = vadd.f32 %v220_v28, %v38_v27 }
  0xd4   :  { %1945 = vmatprep.subr.mxu1 %v2091_v2  ;;  %v1892_v31 = vpop.f32.mrf.mxu0 }
  0xd5   :  { %1946 = vmatpush3.msra.mxu1 %v2290_v23  ;;  %v2309_v32 = vrot.slane %v221_v30, %v2303_v29 }
  0xd6   :  { %1961 = vmatprep.subr.mxu1 %v2091_v2 }
 0x135   :  { %v2312_v33 = vpop.f32.mrf.mxu1 }
 0x137   :  { %v1907_v34 = vpop.f32.mrf.mxu1 }
 0x13a   :  { %v2314_v35 = vpop.f32.mrf.mxu1 }
 0x13c   :  { %v1917_v36 = vpop.f32.mrf.mxu1  ;;  %v374_v37 = vpop.f32.mrf.mxu0 }
 0x13e   :  { %v744_v39 = vpop.f32.mrf.mxu1  ;;  %v1902_v40 = vpop.f32.mrf.mxu0 }
 0x13f   :  { %v745_v41 = vadd.f32 %v744_v39, %v300_v19 }
 0x140   :  { %v1927_v42 = vpop.f32.mrf.mxu1  ;;  %v2328_v45 = vpop.f32.mrf.mxu0 }
 0x141   :  { %v754_v43 = vadd.f32 %v752_v38, %v745_v41  ;;  %v1589_v41 = vrot.slane %v2219_v8, %v2303_v29 }
 0x142   :  { %v1912_v46 = vpop.f32.mrf.mxu0 }
 0x143   :  { %v755_v44 = vmax.f32 %v754_v43, 0.0 }
 0x144   :  { %v2330_v47 = vpop.f32.mrf.mxu0 }
 0x145   :  { %1937 = vmatmul.mubr.msk.f32.vlgmr.msra.gmra.mxu0 %vm762_vm5, %v755_v44 }
 0x146   :  { %1951 = vmatpush3.msra.mxu0 %v2263_v15  ;;  %1958 = vmatprep.mubr.msk.f32.mxu0 %vm2092_vm2, %v2091_v2  ;;  %v1922_v48 = vpop.f32.mrf.mxu0 }
 0x147   :  { %1952 = vmatprep.subr.mxu0 %v2091_v2 }
 0x148   :  { %1953 = vmatpush3.msra.mxu0 %v2270_v16 }
 0x149   :  { %1954 = vmatprep.subr.mxu0 %v2091_v2 }
 0x14a   :  { %1955 = vmatpush3.msra.mxu0 %v2277_v17 }
 0x14b   :  { %1956 = vmatprep.subr.mxu0 %v2091_v2 }
 0x14c   :  { %1957 = vmatpush3.msra.mxu0 %v2284_v18 }
 0x14d   :  { %1972 = vmatprep.subr.mxu0 %v2091_v2 }
 0x205   :  { %v832_v50 = vpop.f32.mrf.mxu0 }
 0x206   :  { %v2338_v51 = vadd.f32 %v2335_v49, %v832_v50 }
 0x207   :  { %v1938_v52 = vpop.f32.mrf.mxu0 }
 0x208   :  { %v836_v53 = vmax.f32 %v2338_v51, 0.0 }
 0x20a   :  { %1948 = vmatmul.mubr.msk.f32.vlgmr.msra.gmra.mxu1 %vm762_vm5, %v836_v53 }
 0x20b   :  { %1962 = vmatpush3.msra.mxu1 %v2292_v24  ;;  %1969 = vmatprep.mubr.msk.f32.mxu1 %vm2092_vm2, %v2091_v2 }
 0x20c   :  { %1963 = vmatprep.subr.mxu1 %v2091_v2 }
 0x20d   :  { %1964 = vmatpush3.msra.mxu1 %v2295_v26 }
 0x20e   :  { %1965 = vmatprep.subr.mxu1 %v2091_v2 }
 0x20f   :  { %1966 = vmatpush3.msra.mxu1 %v2288_v21 }
 0x210   :  { %1967 = vmatprep.subr.mxu1 %v2091_v2 }
 0x211   :  { %1968 = vmatpush3.msra.mxu1 %v2290_v23 }
 0x212   :  { %1983 = vmatprep.subr.mxu1 %v2091_v2 }
 0x2ca   :  { %v910_v54 = vpop.f32.mrf.mxu1 }
 0x2cb   :  { %v911_v55 = vadd.f32 %v910_v54, %v2309_v32 }
 0x2cc   :  { %v1949_v56 = vpop.f32.mrf.mxu1 }
 0x2cd   :  { %v914_v57 = vadd.f32 %v911_v55, %v374_v37 }
 0x2cf   :  { %v915_v58 = vmax.f32 %v914_v57, 0.0 }
 0x2d1   :  { %1959 = vmatmul.mubr.msk.f32.vlgmr.msra.gmra.mxu0 %vm762_vm5, %v915_v58 }
 0x2d2   :  { %1973 = vmatpush3.msra.mxu0 %v2263_v15  ;;  %1980 = vmatprep.mubr.msk.f32.mxu0 %vm2092_vm2, %v2091_v2 }
 0x2d3   :  { %1974 = vmatprep.subr.mxu0 %v2091_v2 }
 0x2d4   :  { %1975 = vmatpush3.msra.mxu0 %v2270_v16 }
 0x2d5   :  { %1976 = vmatprep.subr.mxu0 %v2091_v2 }
 0x2d6   :  { %1977 = vmatpush3.msra.mxu0 %v2277_v17 }
 0x2d7   :  { %1978 = vmatprep.subr.mxu0 %v2091_v2 }
 0x2d8   :  { %1979 = vmatpush3.msra.mxu0 %v2284_v18 }
 0x2d9   :  { %1994 = vmatprep.subr.mxu0 %v2091_v2 }
 0x391   :  { %v985_v59 = vpop.f32.mrf.mxu0 }
 0x392   :  { %v2367_v60 = vadd.f32 %v2335_v49, %v985_v59 }
 0x393   :  { %v1960_v61 = vpop.f32.mrf.mxu0 }
 0x394   :  { %v989_v62 = vmax.f32 %v2367_v60, 0.0 }
 0x396   :  { %1970 = vmatmul.mubr.msk.f32.vlgmr.msra.gmra.mxu1 %vm762_vm5, %v989_v62 }
 0x397   :  { %1984 = vmatpush3.msra.mxu1 %v2292_v24  ;;  %1991 = vmatprep.mubr.msk.f32.mxu1 %vm2092_vm2, %v2091_v2 }
 0x398   :  { %1985 = vmatprep.subr.mxu1 %v2091_v2 }
 0x399   :  { %1986 = vmatpush3.msra.mxu1 %v2295_v26 }
 0x39a   :  { %1987 = vmatprep.subr.mxu1 %v2091_v2 }
 0x39b   :  { %1988 = vmatpush3.msra.mxu1 %v2288_v21 }
 0x39c   :  { %1989 = vmatprep.subr.mxu1 %v2091_v2 }
 0x39d   :  { %1990 = vmatpush3.msra.mxu1 %v2290_v23 }
 0x39e   :  { %2005 = vmatprep.subr.mxu1 %v2091_v2 }
 0x456   :  { %v1059_v63 = vpop.f32.mrf.mxu1 }
 0x457   :  { %v1060_v0 = vadd.f32 %v1059_v63, %v2309_v32 }
 0x458   :  { %v1971_v1 = vpop.f32.mrf.mxu1 }
 0x459   :  { %v1063_v4 = vadd.f32 %v1060_v0, %v2312_v33 }
 0x45b   :  { %v1064_v9 = vmax.f32 %v1063_v4, 0.0 }
 0x45d   :  { %1981 = vmatmul.mubr.msk.f32.vlgmr.msra.gmra.mxu0 %vm762_vm5, %v1064_v9 }
 0x45e   :  { %1995 = vmatpush3.msra.mxu0 %v2263_v15  ;;  %2002 = vmatprep.mubr.msk.f32.mxu0 %vm2092_vm2, %v2091_v2 }
 0x45f   :  { %1996 = vmatprep.subr.mxu0 %v2091_v2 }
 0x460   :  { %1997 = vmatpush3.msra.mxu0 %v2270_v16 }
 0x461   :  { %1998 = vmatprep.subr.mxu0 %v2091_v2 }
 0x462   :  { %1999 = vmatpush3.msra.mxu0 %v2277_v17 }
 0x463   :  { %2000 = vmatprep.subr.mxu0 %v2091_v2 }
 0x464   :  { %2001 = vmatpush3.msra.mxu0 %v2284_v18 }
 0x465   :  { %2016 = vmatprep.subr.mxu0 %v2091_v2 }
 0x51d   :  { %v1134_v10 = vpop.f32.mrf.mxu0 }
 0x51e   :  { %v2397_v11 = vadd.f32 %v2335_v49, %v1134_v10 }
 0x51f   :  { %v1982_v12 = vpop.f32.mrf.mxu0 }
 0x520   :  { %v1138_v13 = vmax.f32 %v2397_v11, 0.0 }
 0x522   :  { %1992 = vmatmul.mubr.msk.f32.vlgmr.msra.gmra.mxu1 %vm762_vm5, %v1138_v13 }
 0x523   :  { %2006 = vmatpush3.msra.mxu1 %v2292_v24  ;;  %2013 = vmatprep.mubr.msk.f32.mxu1 %vm2092_vm2, %v2091_v2 }
 0x524   :  { %2007 = vmatprep.subr.mxu1 %v2091_v2 }
 0x525   :  { %2008 = vmatpush3.msra.mxu1 %v2295_v26 }
 0x526   :  { %2009 = vmatprep.subr.mxu1 %v2091_v2 }
 0x527   :  { %2010 = vmatpush3.msra.mxu1 %v2288_v21 }
 0x528   :  { %2011 = vmatprep.subr.mxu1 %v2091_v2 }
 0x529   :  { %2012 = vmatpush3.msra.mxu1 %v2290_v23 }
 0x52a   :  { %2027 = vmatprep.subr.mxu1 %v2091_v2 }
 0x5e2   :  { %v1208_v14 = vpop.f32.mrf.mxu1 }
 0x5e3   :  { %v1209_v19 = vadd.f32 %v1208_v14, %v2309_v32 }
 0x5e4   :  { %v1993_v20 = vpop.f32.mrf.mxu1 }
 0x5e5   :  { %v1212_v22 = vadd.f32 %v1209_v19, %v2328_v45 }
 0x5e7   :  { %v1213_v25 = vmax.f32 %v1212_v22, 0.0 }
 0x5e9   :  { %2003 = vmatmul.mubr.msk.f32.vlgmr.msra.gmra.mxu0 %vm762_vm5, %v1213_v25 }
 0x5ea   :  { %2017 = vmatpush3.msra.mxu0 %v2263_v15  ;;  %2024 = vmatprep.mubr.msk.f32.mxu0 %vm2092_vm2, %v2091_v2 }
 0x5eb   :  { %2018 = vmatprep.subr.mxu0 %v2091_v2 }
 0x5ec   :  { %2019 = vmatpush3.msra.mxu0 %v2270_v16 }
 0x5ed   :  { %2020 = vmatprep.subr.mxu0 %v2091_v2 }
 0x5ee   :  { %2021 = vmatpush3.msra.mxu0 %v2277_v17 }
 0x5ef   :  { %2022 = vmatprep.subr.mxu0 %v2091_v2 }
 0x5f0   :  { %2023 = vmatpush3.msra.mxu0 %v2284_v18 }
 0x5f1   :  { %2038 = vmatprep.subr.mxu0 %v2091_v2 }
 0x6a9   :  { %v1283_v27 = vpop.f32.mrf.mxu0 }
 0x6aa   :  { %v1284_v28 = vadd.f32 %v2335_v49, %v1283_v27 }
 0x6ab   :  { %v2004_v30 = vpop.f32.mrf.mxu0 }
 0x6ac   :  { %v1287_v31 = vmax.f32 %v1284_v28, 0.0 }
 0x6ae   :  { %2014 = vmatmul.mubr.msk.f32.vlgmr.msra.gmra.mxu1 %vm762_vm5, %v1287_v31 }
 0x6af   :  { %2028 = vmatpush3.msra.mxu1 %v2292_v24  ;;  %2035 = vmatprep.mubr.msk.f32.mxu1 %vm2092_vm2, %v2091_v2 }
 0x6b0   :  { %2029 = vmatprep.subr.mxu1 %v2091_v2 }
 0x6b1   :  { %2030 = vmatpush3.msra.mxu1 %v2295_v26 }
 0x6b2   :  { %2031 = vmatprep.subr.mxu1 %v2091_v2 }
 0x6b3   :  { %2032 = vmatpush3.msra.mxu1 %v2288_v21  ;;  %v225_v21 = vld [vmem:[%s2487_s2] sm:$0xff]  ;;  %s2099_s2 = smov 108  }
 0x6b4   :  { %2033 = vmatprep.subr.mxu1 %v2091_v2  ;;  %1694 = vrot.lane.b32.xlu1 %v225_v21, %s2097_s20 }
 0x6b5   :  { %2034 = vmatpush3.msra.mxu1 %v2290_v23  ;;  %1701 = vrot.lane.b32.xlu0 %v225_v21, %s2098_s21 }
 0x6b6   :  { %2049 = vmatprep.subr.mxu1 %v2208_v7 }
 0x6b8   :  { %1708 = vrot.lane.b32.xlu1 %v225_v21, %s2093_s18  ;;  %s2100_s18 = smov 112  }
 0x6b9   :  { %1715 = vrot.lane.b32.xlu0 %v225_v21, %s2100_s18 }
 0x6bc   :  { %1722 = vrot.lane.b32.xlu1 %v225_v21, %s2099_s2 }
 0x726   :  { %v1695_v46 = vpop.permute.xlu1 %1694 }
 0x76e   :  { %v1357_v33 = vpop.f32.mrf.mxu1 }
 0x76f   :  { %v1358_v24 = vadd.f32 %v1357_v33, %v2309_v32 }
 0x770   :  { %v2015_v34 = vpop.f32.mrf.mxu1 }
 0x771   :  { %v1361_v36 = vadd.f32 %v1358_v24, %v2314_v35 }
 0x773   :  { %v1362_v37 = vmax.f32 %v1361_v36, 0.0 }
 0x775   :  { %2025 = vmatmul.mubr.msk.f32.vlgmr.msra.gmra.mxu0 %vm762_vm5, %v1362_v37 }
 0x776   :  { %2039 = vmatpush3.msra.mxu0 %v2263_v15  ;;  %2046 = vmatprep.mubr.msk.f32.mxu0 %vm2092_vm2, %v2091_v2 }
 0x777   :  { %2040 = vmatprep.subr.mxu0 %v2091_v2 }
 0x778   :  { %2041 = vmatpush3.msra.mxu0 %v2270_v16 }
 0x779   :  { %2042 = vmatprep.subr.mxu0 %v2091_v2 }
 0x77a   :  { %2043 = vmatpush3.msra.mxu0 %v2277_v17 }
 0x77b   :  { %2044 = vmatprep.subr.mxu0 %v2091_v2 }
 0x77c   :  { %2045 = vmatpush3.msra.mxu0 %v2284_v18 }
 0x835   :  { %v1432_v15 = vpop.f32.mrf.mxu0 }
 0x836   :  { %v1433_v16 = vadd.f32 %v2335_v49, %v1432_v15 }
 0x837   :  { %v2026_v23 = vpop.f32.mrf.mxu0 }
 0x838   :  { %v1436_v26 = vmax.f32 %v1433_v16, 0.0 }
 0x83a   :  { %2036 = vmatmul.mubr.msk.f32.vlgmr.msra.gmra.mxu1 %vm762_vm5, %v1436_v26 }
 0x83b   :  { %2050 = vmatpush3.msra.mxu1 %v2208_v7  ;;  %2057 = vmatprep.mubr.msk.f32.mxu1 %vm762_vm5, %v836_v53  ;;  %v1709_v53 = vpop.permute.xlu1 %1708 }
 0x83c   :  { %2051 = vmatprep.subr.mxu1 %v2195_v6 }
 0x83d   :  { %2052 = vmatpush3.msra.mxu1 %v2195_v6 }
 0x83e   :  { %2053 = vmatprep.subr.mxu1 %v2189_v5 }
 0x83f   :  { %2054 = vmatpush3.msra.mxu1 %v2189_v5  ;;  %v1723_v59 = vpop.permute.xlu1 %1722 }
 0x840   :  { %2055 = vmatprep.subr.mxu1 %v2179_v3 }
 0x841   :  { %2056 = vmatpush3.msra.mxu1 %v2179_v3 }
 0x842   :  { %2058 = vmatmul.mubr.msk.f32.vlgmr.msra.gmra.mxu1 %vm762_vm5, %v989_v62 }
 0x843   :  { %2060 = vmatprep.mubr.msk.f32.mxu1 %vm762_vm5, %v1138_v13 }
 0x846   :  { %2061 = vmatmul.mubr.msk.f32.gmra.mxu1 %vm762_vm5, %v1287_v31 }
 0x847   :  { %2063 = vmatprep.mubr.msk.f32.mxu1 %vm762_vm5, %v1436_v26 }
 0x8fa   :  { %v1506_v2 = vpop.f32.mrf.mxu1 }
 0x8fb   :  { %v1507_v6 = vadd.f32 %v1506_v2, %v2309_v32 }
 0x8fc   :  { %v2037_v5 = vpop.f32.mrf.mxu1 }
 0x8fd   :  { %v1510_v7 = vadd.f32 %v1507_v6, %v2330_v47  ;;  %v1702_v47 = vpop.permute.xlu0 %1701 }
 0x8ff   :  { %v1511_v17 = vmax.f32 %v1510_v7, 0.0 }
 0x901   :  { %2047 = vmatmul.mubr.msk.f32.vlgmr.msra.gmra.mxu0 %vm762_vm5, %v1511_v17  ;;  %v1716_v62 = vpop.permute.xlu0 %1715 }
 0x902   :  { %v2059_v39 = vpop.f32.mrf.mxu1 }
 0x903   :  { %v1666_v44 = vadd.f32 %v2059_v39, %v1589_v41 }
 0x904   :  { %v1660_v40 = vpop.f32.mrf.mxu1 }
 0x905   :  { %v1661_v43 = vadd.f32 %v1660_v40, %v1589_v41  ;;  %v1697_v50 = vsub.f32 %v1666_v44, %v1695_v46 }
 0x906   :  { %v2062_v32 = vpop.f32.mrf.mxu1 }
 0x907   :  { %v1689_v48 = vsub.f32 %v1661_v43, %v225_v21  ;;  %v1676_v52 = vadd.f32 %v2062_v32, %v1589_v41  ;;  %v1698_v54 = vmul.f32 %v1697_v50, %v1697_v50 }
 0x908   :  { %v1670_v42 = vpop.f32.mrf.mxu1 }
 0x909   :  { %v1671_v45 = vadd.f32 %v1670_v42, %v1589_v41  ;;  %v1711_v57 = vsub.f32 %v1676_v52, %v1709_v53  ;;  %v1699_v60 = vmul.f32 0.9801, %v1698_v54 }
 0x90b   :  { %v1704_v51 = vsub.f32 %v1671_v45, %v1702_v47  ;;  %v1712_v63 = vmul.f32 %v1711_v57, %v1711_v57 }
 0x90d   :  { %v1705_v55 = vmul.f32 %v1704_v51, %v1704_v51  ;;  %v1713_v11 = vmul.f32 0.960596, %v1712_v63 }
 0x90f   :  { %v1706_v8 = vmul.f32 0.970299, %v1705_v55 }
 0x9c1   :  { %v1581_v3 = vpop.f32.mrf.mxu0 }
 0x9c2   :  { %v1582_v18 = vadd.f32 %v2335_v49, %v1581_v3  ;;  %v1690_v49 = vmul.f32 %v1689_v48, %v1689_v48 }
 0x9c3   :  { %v2048_v35 = vpop.f32.mrf.mxu0 }
 0x9c4   :  { %v1585_v38 = vmax.f32 %v1582_v18, 0.0  ;;  %v1691_v56 = vmul.f32 0.99, %v1690_v49 }
 0x9c6   :  { %2064 = vmatmul.mubr.msk.f32.gmra.mxu1 %vm762_vm5, %v1585_v38  ;;  %v1700_v0 = vadd.f32 %v1699_v60, %v1691_v56 }
 0x9c8   :  { %v1707_v9 = vadd.f32 %v1706_v8, %v1700_v0 }
 0x9ca   :  { %v1714_v14 = vadd.f32 %v1713_v11, %v1707_v9 }
 0xa86   :  { %v2065_v58 = vpop.f32.mrf.mxu1 }
 0xa87   :  { %v1686_v29 = vadd.f32 %v2065_v58, %v1589_v41 }
 0xa88   :  { %v1680_v61 = vpop.f32.mrf.mxu1 }
 0xa89   :  { %v1725_v1 = vsub.f32 %v1686_v29, %v1723_v59  ;;  %v1681_v4 = vadd.f32 %v1680_v61, %v1589_v41 }
 0xa8b   :  { %v1718_v10 = vsub.f32 %v1681_v4, %v1716_v62  ;;  %v1726_v12 = vmul.f32 %v1725_v1, %v1725_v1 }
 0xa8d   :  { %v1719_v13 = vmul.f32 %v1718_v10, %v1718_v10  ;;  %v1727_v20 = vmul.f32 0.94148016, %v1726_v12 }
 0xa8f   :  { %v1720_v19 = vmul.f32 0.95099, %v1719_v13 }
 0xa91   :  { %v1721_v22 = vadd.f32 %v1720_v19, %v1714_v14 }
 0xa93   :  { %v1728_v25 = vadd.f32 %v1727_v20, %v1721_v22 }
 0xa95   :  { %v1729_v27 = vsel %vm49_vm4, %v1728_v25, 0.0 }
 0xa96   :  { %1730 = vadd.xlane.f32.xlu0 %v1729_v27 }
 0xb1f   :  { %v1731_v28 = vpop.xlane.xlu0 %1730 }
 0xb20   :  { %v1732_v30 = vrot.slane %v1731_v28, 4 }
 0xb22   :  { %v1733_v31 = vadd.f32 %v1732_v30, %v1731_v28 }
 0xb24   :  { %v1734_v33 = vrot.slane %v1733_v31, 2 }
 0xb26   :  { %v1735_v24 = vadd.f32 %v1734_v33, %v1733_v31 }
 0xb28   :  { %v1736_v34 = vrot.slane %v1735_v24, 1 }
 0xb2a   :  { %v1737_v36 = vadd.f32 %v1736_v34, %v1735_v24 }
 0xb2c   :  { %2066 = vpush %v1737_v36 }
 0xb5d   :  { %s2067_s22 = spop %2066 }
 0xb5e   :  { %s1739_s23 = smul.f32 0.03125, %s2067_s22 }
 0xb60   :  { %1741 = sst [smem:[#allocation2]] %s1739_s23 }
 0xb61   :  { %1749 = dma.smem_to_hbm %s2101_s24, 16, %s2495_s10, [#allocation3]  }
 0xb62   :  { %2088 = dma.done.wait [#allocation3], 16  }
 0xb63   :  { %2089 = vsyncadd [#allocation3], 4294967280 }
 0xb64   :  { %1753 = sfence }
 0xb65   :  { %1754 = vsyncpa [#allocation3], 1 }

</bundles_post_ra>
